<compile_context>
chip_gen: v7x
topology: tpu7x:2x2x1
jax: 0.10.0
libtpu: 0.0.40
codegen_flags: <defaults>
</compile_context>

<pallas_src>
import jax
import jax.numpy as jnp
from jax import lax
from jax.experimental import pallas as pl
from jax.experimental.pallas import tpu as pltpu

MAX_NORM = 1.0
RENORM_EPS = 1e-7      # torch.embedding_renorm_ epsilon
NEG_BIG = -1e30        # bias for padded vocab columns (exp underflows to 0)


def _round_up(x, m):
    return ((x + m - 1) // m) * m


def skipgram_kernel(embed_ref, wt_ref, b_ref, out_ref, m_sc, l_sc):
    # embed_ref : (TB, D)   bf16  pre-renormed gathered embeddings (batch tile)
    # wt_ref    : (D, TV)   bf16  Linear weight tile (pre-transposed, streamed)
    # b_ref     : (1, Vp)   f32   full Linear bias (resident)
    # out_ref   : (TB, Vp)        log-prob row slab (resident across vocab tiles)
    # m_sc,l_sc : (TB, 1)   f32   online logsumexp state
    j = pl.program_id(1)
    tv = wt_ref.shape[1]

    @pl.when(j == 0)
    def _init():
        m_sc[...] = jnp.full_like(m_sc, -jnp.inf)
        l_sc[...] = jnp.zeros_like(l_sc)

    # Linear tile: (TB, D) @ (D, TV) + bias, f32 accumulation on the MXU.
    col = pl.multiple_of(j * tv, tv)
    logits = jnp.dot(embed_ref[...], wt_ref[...],
                     preferred_element_type=jnp.float32)
    logits = logits + b_ref[:, pl.ds(col, tv)]          # (1, TV) broadcast

    # Park unnormalized logits directly in the resident output row slab.
    out_ref[:, pl.ds(col, tv)] = logits.astype(out_ref.dtype)

    # Online (flash-style) logsumexp across vocab tiles.
    m_prev = m_sc[...]
    m_new = jnp.maximum(m_prev, jnp.max(logits, axis=-1, keepdims=True))
    l_sc[...] = (l_sc[...] * jnp.exp(m_prev - m_new)
                 + jnp.sum(jnp.exp(logits - m_new), axis=-1, keepdims=True))
    m_sc[...] = m_new

    @pl.when(j == pl.num_programs(1) - 1)
    def _finalize():
        lse = m_sc[...] + jnp.log(l_sc[...])             # (TB, 1)
        out_ref[...] = (out_ref[...].astype(jnp.float32) - lse
                        ).astype(out_ref.dtype)


def prepare_skipgram_params(emb_table, lin_w, lin_b, *, tv=2048):
    """One-time parameter prep: transpose Linear weight to (D, V), cast to
    bf16, pad the vocab axis to a multiple of the vocab tile size."""
    V, D = emb_table.shape
    tv = min(tv, _round_up(V, 128))
    v_pad = _round_up(V, tv)

    wt = jnp.zeros((D, v_pad), jnp.bfloat16)
    wt = wt.at[:, :V].set(lin_w.T.astype(jnp.bfloat16))
    b = jnp.full((1, v_pad), NEG_BIG, jnp.float32)
    b = b.at[:, :V].set(lin_b.astype(jnp.float32).reshape(1, V))

    return {
        "emb_table": emb_table.astype(jnp.float32),
        "wt": wt,                  # (D, Vpad) bf16, transposed once
        "bias": b,                 # (1, Vpad) f32
        "vocab_size": V,
        "tv": tv,
    }


def _vmem_footprint(tb, tv, v_pad, D, out_bytes):
    """Rough VMEM accounting (lane/sublane padded, double-buffered inputs)."""
    dl = _round_up(D, 128)
    return (2 * tb * dl * 2                       # embed tiles (bf16, x2 buf)
            + 2 * _round_up(D, 8) * tv * 2        # weight tiles (bf16, x2 buf)
            + 2 * 8 * v_pad * 4                   # resident bias (x2 buf)
            + 2 * tb * v_pad * out_bytes          # resident output row slab
            + 2 * tb * 128 * 4)                   # m/l scratch (lane padded)


def _vmem_budget():
    """Generation-aware VMEM budget (~80% of physical capacity)."""
    try:
        cap = getattr(pltpu.get_tpu_info(), "vmem_capacity_bytes", None)
    except Exception:
        cap = None
    if not cap:
        cap = 64 * 1024 * 1024                    # conservative (v7x) fallback
    return int(0.8 * cap)


def skipgram_forward(target, params, *, tb=256, out_dtype=jnp.float32):
    """target: (B,) int32. Returns (B, V) log-probabilities."""
    emb_table = params["emb_table"]
    wt = params["wt"]
    bias = params["bias"]
    V = params["vocab_size"]
    tv = params["tv"]

    B = target.shape[0]
    D = emb_table.shape[1]
    v_pad = wt.shape[1]
    nv = v_pad // tv
    out_bytes = jnp.dtype(out_dtype).itemsize

    # --- batch tiling ---------------------------------------------------
    tb = min(tb, _round_up(B, 8))
    if B >= 16:
        # keep at least two batch tiles so the 'parallel' axis feeds both
        # TensorCores on v7x.
        tb = min(tb, _round_up(-(-B // 2), 8))
    # Shrink tb until the resident output slab + double-buffers fit VMEM.
    budget = _vmem_budget()
    while tb > 8 and _vmem_footprint(tb, tv, v_pad, D, out_bytes) > budget:
        tb = max(8, _round_up(tb // 2, 8))
    b_pad = _round_up(B, tb)
    nb = b_pad // tb

    # --- glue: embedding gather + max_norm renorm on the tiny (B, D) -----
    embed = emb_table[target]                                    # (B, D) f32
    norm = jnp.sqrt(jnp.sum(embed * embed, axis=-1, keepdims=True))
    scale = jnp.where(norm > MAX_NORM, MAX_NORM / (norm + RENORM_EPS), 1.0)
    embed = (embed * scale).astype(jnp.bfloat16)
    if b_pad != B:
        embed = jnp.pad(embed, ((0, b_pad - B), (0, 0)))

    vmem_need = _vmem_footprint(tb, tv, v_pad, D, out_bytes)
    vmem_limit = int(min(max(int(1.25 * vmem_need), 16 * 1024 * 1024), budget))

    out = pl.pallas_call(
        skipgram_kernel,
        out_shape=jax.ShapeDtypeStruct((b_pad, v_pad), out_dtype),
        grid_spec=pltpu.PrefetchScalarGridSpec(
            num_scalar_prefetch=0,
            grid=(nb, nv),
            in_specs=[
                pl.BlockSpec((tb, D), lambda i, j: (i, 0)),      # embeddings
                pl.BlockSpec((D, tv), lambda i, j: (0, j)),      # weight tile
                pl.BlockSpec((1, v_pad), lambda i, j: (0, 0)),   # bias (whole)
            ],
            out_specs=pl.BlockSpec((tb, v_pad), lambda i, j: (i, 0)),
            scratch_shapes=[
                pltpu.VMEM((tb, 1), jnp.float32),                # m_sc
                pltpu.VMEM((tb, 1), jnp.float32),                # l_sc
            ],
        ),
        compiler_params=pltpu.CompilerParams(
            dimension_semantics=("parallel", "arbitrary"),
            vmem_limit_bytes=vmem_limit,
        ),
    )(embed, wt, bias)

    return out[:B, :V]


def reference_forward(target, emb_table, lin_w, lin_b):
    e = emb_table[target]
    norm = jnp.linalg.norm(e, axis=-1, keepdims=True)
    scale = jnp.where(norm > MAX_NORM, MAX_NORM / (norm + RENORM_EPS), 1.0)
    e = e * scale
    logits = e @ lin_w.T + lin_b
    return jax.nn.log_softmax(logits, axis=-1)


if __name__ == "__main__":
    VOCAB = 128
    EMB_DIM = 32
    BATCH = 8

    key = jax.random.PRNGKey(0)
    k1, k2, k3, k4 = jax.random.split(key, 4)

    # Deterministic synthetic parameters (not a checkpoint load).
    emb_table = jax.random.normal(k1, (VOCAB, EMB_DIM), dtype=jnp.float32)
    lin_w = jax.random.normal(k2, (VOCAB, EMB_DIM), dtype=jnp.float32) * 0.1
    lin_b = jax.random.normal(k3, (VOCAB,), dtype=jnp.float32) * 0.01
    target = jax.random.randint(k4, (BATCH,), 0, VOCAB, dtype=jnp.int32)

    params = prepare_skipgram_params(emb_table, lin_w, lin_b)
    out = skipgram_forward(target, params)
    out = jax.block_until_ready(out)

    ref = reference_forward(target, emb_table, lin_w, lin_b)
    assert out.shape == (BATCH, VOCAB)
    max_err = float(jnp.max(jnp.abs(out - ref)))
    assert max_err < 2e-2, f"mismatch vs reference, max abs err = {max_err}"
    # log-softmax rows must sum to ~1 in probability space
    assert jnp.allclose(jnp.sum(jnp.exp(out), axis=-1), 1.0, atol=1e-3)

    print("KERNEL_OK")
</pallas_src>

<mosaic_0001>
module attributes {stable_mosaic.version = 11 : i64} {
  func.func @skipgram_kernel(%arg0: i32, %arg1: i32, %arg2: memref<8x32xbf16, #tpu.memory_space<vmem>>, %arg3: memref<32x128xbf16, #tpu.memory_space<vmem>>, %arg4: memref<1x128xf32, #tpu.memory_space<vmem>>, %arg5: memref<8x128xf32, #tpu.memory_space<vmem>>, %arg6: memref<8x1xf32, #tpu.memory_space<vmem>>, %arg7: memref<8x1xf32, #tpu.memory_space<vmem>>) attributes {dimension_semantics = [#tpu.dimension_semantics<parallel>, #tpu.dimension_semantics<arbitrary>], iteration_bounds = array<i64: 1, 1>, scalar_prefetch = 0 : i64, scratch_operands = 2 : i64, tpu.core_type = #tpu.core_type<tc>, window_params = [{transform_indices = @transform_0, window_bounds = array<i64: 8, 32>}, {transform_indices = @transform_1, window_bounds = array<i64: 32, 128>}, {pipeline_mode = #tpu.pipeline_mode<synchronous>, transform_indices = @transform_2, window_bounds = array<i64: 1, 128>}, {transform_indices = @transform_3, window_bounds = array<i64: 8, 128>}]} {
    %c0_i32 = arith.constant 0 : i32
    %0 = arith.cmpi eq, %arg1, %c0_i32 : i32
    %1 = arith.extui %0 : i1 to i32
    %c0_i32_0 = arith.constant 0 : i32
    %2 = arith.cmpi ne, %1, %c0_i32_0 : i32
    scf.if %2 {
      %cst_18 = arith.constant 0xFF800000 : f32
      %33 = vector.broadcast %cst_18 : f32 to vector<8x1xf32>
      %c0_19 = arith.constant 0 : index
      %c0_20 = arith.constant 0 : index
      %34 = vector.load %arg6[%c0_19, %c0_20] : memref<8x1xf32, #tpu.memory_space<vmem>>, vector<8x1xf32>
      tpu.vector_store %arg6[%c0_19, %c0_20], %33 {strides = array<i32>} : memref<8x1xf32, #tpu.memory_space<vmem>>, vector<8x1xf32>,
      %cst_21 = arith.constant 0.000000e+00 : f32
      %35 = vector.broadcast %cst_21 : f32 to vector<8x1xf32>
      %c0_22 = arith.constant 0 : index
      %c0_23 = arith.constant 0 : index
      %36 = vector.load %arg7[%c0_22, %c0_23] : memref<8x1xf32, #tpu.memory_space<vmem>>, vector<8x1xf32>
      tpu.vector_store %arg7[%c0_22, %c0_23], %35 {strides = array<i32>} : memref<8x1xf32, #tpu.memory_space<vmem>>, vector<8x1xf32>,
    } else {
    }
    %c128_i32 = arith.constant 128 : i32
    %3 = arith.muli %arg1, %c128_i32 : i32
    %4 = tpu.assume_multiple %3, 128 : i32
    %c0 = arith.constant 0 : index
    %c0_1 = arith.constant 0 : index
    %5 = vector.load %arg2[%c0, %c0_1] : memref<8x32xbf16, #tpu.memory_space<vmem>>, vector<8x32xbf16>
    %c0_2 = arith.constant 0 : index
    %c0_3 = arith.constant 0 : index
    %6 = vector.load %arg3[%c0_2, %c0_3] : memref<32x128xbf16, #tpu.memory_space<vmem>>, vector<32x128xbf16>
    %cst = arith.constant dense<0.000000e+00> : vector<8x128xf32>
    %7 = tpu.matmul %5, %6, %cst {dimension_numbers = #tpu.dot_dimension_numbers<[1], [0], [0], [1], [0, 0, 1, 1], [], []>} : vector<8x32xbf16>, vector<32x128xbf16>, vector<8x128xf32> -> vector<8x128xf32>
    %c0_4 = arith.constant 0 : index
    %8 = arith.index_cast %4 : i32 to index
    %9 = vector.load %arg4[%c0_4, %8] : memref<1x128xf32, #tpu.memory_space<vmem>>, vector<1x128xf32>
    %10 = vector.broadcast %9 : vector<1x128xf32> to vector<8x128xf32>
    %11 = arith.addf %7, %10 : vector<8x128xf32>
    %c0_5 = arith.constant 0 : index
    %12 = arith.index_cast %4 : i32 to index
    %13 = vector.load %arg5[%c0_5, %12] : memref<8x128xf32, #tpu.memory_space<vmem>>, vector<8x128xf32>
    tpu.vector_store %arg5[%c0_5, %12], %11 {strides = array<i32>} : memref<8x128xf32, #tpu.memory_space<vmem>>, vector<8x128xf32>,
    %c0_6 = arith.constant 0 : index
    %c0_7 = arith.constant 0 : index
    %14 = vector.load %arg6[%c0_6, %c0_7] : memref<8x1xf32, #tpu.memory_space<vmem>>, vector<8x1xf32>
    %cst_8 = arith.constant dense<0xFF800000> : vector<8xf32>
    %15 = vector.multi_reduction <maximumf>, %11, %cst_8 [1] : vector<8x128xf32> to vector<8xf32>
    %16 = vector.shape_cast %15 : vector<8xf32> to vector<8x1xf32>
    %17 = arith.maximumf %14, %16 : vector<8x1xf32>
    %c0_9 = arith.constant 0 : index
    %c0_10 = arith.constant 0 : index
    %18 = vector.load %arg7[%c0_9, %c0_10] : memref<8x1xf32, #tpu.memory_space<vmem>>, vector<8x1xf32>
    %19 = arith.subf %14, %17 : vector<8x1xf32>
    %20 = math.exp %19 : vector<8x1xf32>
    %21 = arith.mulf %18, %20 : vector<8x1xf32>
    %22 = vector.broadcast %17 : vector<8x1xf32> to vector<8x128xf32>
    %23 = arith.subf %11, %22 : vector<8x128xf32>
    %24 = math.exp %23 : vector<8x128xf32>
    %cst_11 = arith.constant dense<0.000000e+00> : vector<8xf32>
    %25 = vector.multi_reduction <add>, %24, %cst_11 [1] : vector<8x128xf32> to vector<8xf32>
    %26 = vector.shape_cast %25 : vector<8xf32> to vector<8x1xf32>
    %27 = arith.addf %21, %26 : vector<8x1xf32>
    %c0_12 = arith.constant 0 : index
    %c0_13 = arith.constant 0 : index
    %28 = vector.load %arg7[%c0_12, %c0_13] : memref<8x1xf32, #tpu.memory_space<vmem>>, vector<8x1xf32>
    tpu.vector_store %arg7[%c0_12, %c0_13], %27 {strides = array<i32>} : memref<8x1xf32, #tpu.memory_space<vmem>>, vector<8x1xf32>,
    %c0_14 = arith.constant 0 : index
    %c0_15 = arith.constant 0 : index
    %29 = vector.load %arg6[%c0_14, %c0_15] : memref<8x1xf32, #tpu.memory_space<vmem>>, vector<8x1xf32>
    tpu.vector_store %arg6[%c0_14, %c0_15], %17 {strides = array<i32>} : memref<8x1xf32, #tpu.memory_space<vmem>>, vector<8x1xf32>,
    %c0_i32_16 = arith.constant 0 : i32
    %30 = arith.cmpi eq, %arg1, %c0_i32_16 : i32
    %31 = arith.extui %30 : i1 to i32
    %c0_i32_17 = arith.constant 0 : i32
    %32 = arith.cmpi ne, %31, %c0_i32_17 : i32
    scf.if %32 {
      %c0_18 = arith.constant 0 : index
      %c0_19 = arith.constant 0 : index
      %33 = vector.load %arg6[%c0_18, %c0_19] : memref<8x1xf32, #tpu.memory_space<vmem>>, vector<8x1xf32>
      %c0_20 = arith.constant 0 : index
      %c0_21 = arith.constant 0 : index
      %34 = vector.load %arg7[%c0_20, %c0_21] : memref<8x1xf32, #tpu.memory_space<vmem>>, vector<8x1xf32>
      %35 = math.log %34 : vector<8x1xf32>
      %36 = arith.addf %33, %35 : vector<8x1xf32>
      %c0_22 = arith.constant 0 : index
      %c0_23 = arith.constant 0 : index
      %37 = vector.load %arg5[%c0_22, %c0_23] : memref<8x128xf32, #tpu.memory_space<vmem>>, vector<8x128xf32>
      %38 = vector.broadcast %36 : vector<8x1xf32> to vector<8x128xf32>
      %39 = arith.subf %37, %38 : vector<8x128xf32>
      %c0_24 = arith.constant 0 : index
      %c0_25 = arith.constant 0 : index
      %40 = vector.load %arg5[%c0_24, %c0_25] : memref<8x128xf32, #tpu.memory_space<vmem>>, vector<8x128xf32>
      tpu.vector_store %arg5[%c0_24, %c0_25], %39 {strides = array<i32>} : memref<8x128xf32, #tpu.memory_space<vmem>>, vector<8x128xf32>,
    } else {
    }
    return
  }
  func.func @transform_0(%arg0: i32, %arg1: i32) -> (i32, i32) {
    %c0_i32 = arith.constant 0 : i32
    %c0_i32_0 = arith.constant 0 : i32
    return %arg0, %c0_i32 : i32, i32
  }
  func.func @transform_1(%arg0: i32, %arg1: i32) -> (i32, i32) {
    %c0_i32 = arith.constant 0 : i32
    %c0_i32_0 = arith.constant 0 : i32
    return %c0_i32, %arg1 : i32, i32
  }
  func.func @transform_2(%arg0: i32, %arg1: i32) -> (i32, i32) {
    %c0_i32 = arith.constant 0 : i32
    %c0_i32_0 = arith.constant 0 : i32
    %c0_i32_1 = arith.constant 0 : i32
    return %c0_i32, %c0_i32_0 : i32, i32
  }
  func.func @transform_3(%arg0: i32, %arg1: i32) -> (i32, i32) {
    %c0_i32 = arith.constant 0 : i32
    %c0_i32_0 = arith.constant 0 : i32
    return %arg0, %c0_i32 : i32, i32
  }
}

</mosaic_0001>

<bundles_post_ra>
// kernel: tpu_custom_call.1
= control target key start
LH: loop header
LB: loop body
LE: loop exit
PB: predicated region body
PF: predicated region fallthrough
CT: control target
= control target key end

     0   :  { %8 = vsyncpa [#allocation5], 0  ;;  %s365_s0 = inlined_call_operand.hbm [shape: bf16[8,32], index: 0, kind: input, shape index: {}]   ;;  %s366_s1 = inlined_call_operand.hbm [shape: bf16[32,128], index: 1, kind: input, shape index: {}]   ;;  %s367_s2 = inlined_call_operand.vmem [shape: f32[1,128], index: 2, kind: input, shape index: {}]   ;;  %s368_s3 = inlined_call_operand.hbm [shape: f32[8,128], index: 3, kind: output, shape index: {}]  }
   0x1   :  { %9 = vsyncpa [#allocation8], 0 }
   0x2   :  { %10 = vsyncpa [#allocation6], 0  ;;  %s286_s12 = smov [#allocation4]   ;;  %s287_s14 = smov [#allocation7]  }
   0x3   :  { %s17_s13 = sshll.u32 %s286_s12, 4  ;;  %s26_s15 = sshll.u32 %s287_s14, 4  ;;  %s18_s13 = int_to_ptr.vmem [resolvable:$true] %s17_s13  ;;  %s315_s15 = int_to_ptr.vmem [resolvable:$true] %s26_s15 }
   0x4   :  { %s214_s18 = scalar_lea.hbm %s365_s0, 64 }
   0x5   :  { %p215_p0 = scmp.ne.s32.totalorder %s365_s0, %s214_s18  ;;  %p218_p1 = scmp.lt.u32.totalorder %s214_s18, %s365_s0 }
   0x7   :  { %p220_p2 = pnand %p218_p1, %p215_p0 }
   0x9   :  { %223 = shalt.err (!%p220_p2)
}
   0xa   :  { %s224_s23 = scalar_lea.vmem %s18_s13, 64  ;;  %p229_p4 = scmp.lt.s32.totalorder %s18_s13, %s18_s13 }
   0xb   :  { %p225_p3 = scmp.ne.s32.totalorder %s18_s13, %s224_s23  ;;  %p230_p5 = scmp.lt.s32.totalorder %s224_s23, %s224_s23 }
   0xd   :  { %p231_p6 = por %p230_p5, %p229_p4 }
   0xf   :  { %p232_p7 = pnand %p231_p6, %p225_p3 }
  0x11   :  { %235 = shalt.err (!%p232_p7)
}
  0x12   :  { %20 = dma.hbm_to_vmem [thread:$0]  %s365_s0, 64, %s18_s13, [#allocation5]  }
  0x13   :  { %s236_s28 = scalar_lea.hbm %s366_s1, 256 }
  0x14   :  { %p237_p8 = scmp.ne.s32.totalorder %s366_s1, %s236_s28  ;;  %p240_p9 = scmp.lt.u32.totalorder %s236_s28, %s366_s1 }
  0x16   :  { %p242_p10 = pnand %p240_p9, %p237_p8 }
  0x18   :  { %245 = shalt.err (!%p242_p10)
}
  0x19   :  { %s246_s6 = scalar_lea.vmem %s315_s15, 256  ;;  %p251_p12 = scmp.lt.s32.totalorder %s315_s15, %s315_s15 }
  0x1a   :  { %p247_p11 = scmp.ne.s32.totalorder %s315_s15, %s246_s6  ;;  %p252_p13 = scmp.lt.s32.totalorder %s246_s6, %s246_s6 }
  0x1c   :  { %p253_p0 = por %p252_p13, %p251_p12 }
  0x1e   :  { %p254_p1 = pnand %p253_p0, %p247_p11 }
  0x20   :  { %257 = shalt.err (!%p254_p1)
}
  0x21   :  { %s288_s0 = smov 64   ;;  %s289_s7 = smov 4  }
  0x22   :  { %32 = dma.hbm_to_vmem [thread:$0]  %s366_s1, 256, %s315_s15, [#allocation8], %s288_s0, %s288_s0, %s289_s7  }
  0x23   :  { %280 = dma.done.wait [#allocation5], 64  }
  0x24   :  { %281 = vsyncadd [#allocation5], 4294967232 }
  0x25   :  { %282 = dma.done.wait [#allocation8], 256  }
  0x26   :  { %283 = vsyncadd [#allocation8], 4294967040  ;;  %vm46_vm0 = vcmask 7168   ;;  %v290_v0 = vmov 0.0   ;;  %vm291_vm1 = vmmov 0   ;;  %v206_v1 = vld [vmem:[#allocation7] sm:$0xff]  }
  0x27   :  { %48 = vst.msk [vmem:[#allocation3] sm:$0xff] %vm46_vm0, %v290_v0  ;;  %187 = vmatprep.subr.bf16.mxu0 %v290_v0  ;;  %191 = vmatprep.mubr.msk.bf16.mxu0 %vm291_vm1, %v290_v0  ;;  %v207_v2 = vld [vmem:[#allocation7 + $0x8] sm:$0xff]   ;;  %v50_v3 = vld [vmem:[#allocation4] sm:$0xf]  ;;  %vm77_vm2 = vcmask 261120   ;;  %v292_v4 = vmov -inf  }
  0x28   :  { %188 = vmatpush3.bf16.msra.mxu0 %v206_v1  ;;  %47 = vst.msk [vmem:[#allocation2] sm:$0xff] %vm46_vm0, %v292_v4  ;;  %v180_v5 = vld [vmem:[%s367_s2] ss:$0 sm:$0xff]  ;;  %v293_v11 = vmov 0   ;;  %s294_s2 = smov [#allocation9]  }
  0x29   :  { %189 = vmatprep.subr.bf16.mxu0 %v290_v0  ;;  %204 = vset.pattern.permute.xlu0 %v293_v11  ;;  %s168_s11 = sshll.u32 %s294_s2, 4  ;;  %s169_s11 = int_to_ptr.vmem [resolvable:$true] %s168_s11 }
  0x2a   :  { %205 = vset.pattern.permute.xlu1 %v293_v11  ;;  %s258_s12 = scalar_lea.vmem %s169_s11, 128  ;;  %p263_p3 = scmp.lt.s32.totalorder %s169_s11, %s169_s11 }
  0x2b   :  { %p259_p2 = scmp.ne.s32.totalorder %s169_s11, %s258_s12  ;;  %p264_p4 = scmp.lt.s32.totalorder %s258_s12, %s258_s12 }
  0x2c   :  { %190 = vmatpush3.bf16.msra.mxu0 %v207_v2 }
  0x2d   :  { %p265_p5 = por %p264_p4, %p263_p3 }
  0x2e   :  { %v127_v22 = vld [vmem:[#allocation3] sm:$0xff] }
  0x2f   :  { %192 = vmatmul.mubr.msk.bf16.vlgmr.msra.gmra.mrb[0].mxu0 %vm77_vm2, %v50_v3  ;;  %v123_v12 = vld [vmem:[#allocation2] sm:$0xff]  ;;  %p266_p6 = pnand %p265_p5, %p259_p2 }
 0x102   :  { %v115_v6 = vpop.f32.mrb[0].mxu0 }
 0x103   :  { %v116_v7 = vadd.f32 %v180_v5, %v115_v6  ;;  %v193_v8 = vpop.f32.mrb[1].mxu0 }
 0x104   :  { %v118_v9 = vpop.f32.mrb[2].mxu0 }
 0x105   :  { %124 = vmax.xlane.f32.xlu0 %v116_v7  ;;  %v194_v10 = vpop.f32.mrb[3].mxu0 }
 0x192   :  { %v125_v13 = vpop.xlane.xlu0 %124 }
 0x193   :  { %v126_v14 = vmax.f32 %v123_v12, %v125_v13 }
 0x195   :  { %v128_v15 = vsub.f32 %v123_v12, %v126_v14  ;;  %145 = vst.msk [vmem:[#allocation2] sm:$0xff] %vm46_vm0, %v126_v14  ;;  %134 = vperm.xlu0 %204, %v126_v14  }
 0x197   :  { %v129_v20 = vmul.f32 1.442695, %v128_v15 }
 0x19c   :  { %v149_v29 = vld [vmem:[#allocation2] sm:$0xff] }
 0x214   :  { %v135_v16 = vpop.permute.xlu0 %134 }
 0x215   :  { %v137_v17 = vsub.f32 %v116_v7, %v135_v16 }
 0x217   :  { %v138_v18 = vmul.f32 1.442695, %v137_v17 }
 0x219   :  { %208 = vpow2.f32 %v138_v18 }
 0x21a   :  { %210 = vpow2.f32 %v129_v20 }
 0x223   :  { %v209_v19 = vpop.eup %208 }
 0x224   :  { %140 = vadd.xlane.f32.xlu1 %v209_v19  ;;  %v211_v21 = vpop.eup %210 }
 0x225   :  { %v131_v23 = vmul.f32 %v211_v21, %v127_v22 }
 0x2b1   :  { %v141_v24 = vpop.xlane.xlu1 %140 }
 0x2b2   :  { %v142_v25 = vadd.f32 %v141_v24, %v131_v23 }
 0x2b4   :  { %144 = vst.msk [vmem:[#allocation3] sm:$0xff] %vm46_vm0, %v142_v25 }
 0x2bb   :  { %v150_v26 = vld [vmem:[#allocation3] sm:$0xff] }
 0x2bc   :  { %212 = vlog2.f32 %v150_v26 }
 0x2c6   :  { %v213_v27 = vpop.eup %212 }
 0x2c7   :  { %v152_v28 = vmul.f32 0.6931472, %v213_v27 }
 0x2c9   :  { %v153_v30 = vadd.f32 %v152_v28, %v149_v29 }
 0x2cb   :  { %157 = vperm.xlu1 %205, %v153_v30  }
 0x34a   :  { %v158_v31 = vpop.permute.xlu1 %157 }
 0x34b   :  { %v160_v32 = vsub.f32 %v116_v7, %v158_v31 }
 0x34d   :  { %161 = vst [vmem:[#allocation9] sm:$0xff] %v160_v32 }
 0x34e   :  { %269 = shalt.err (!%p266_p6)
}
 0x34f   :  { %s270_s15 = scalar_lea.hbm %s368_s3, 128 }
 0x350   :  { %p271_p7 = scmp.ne.s32.totalorder %s368_s3, %s270_s15  ;;  %p274_p8 = scmp.lt.u32.totalorder %s270_s15, %s368_s3 }
 0x352   :  { %p276_p9 = pnand %p274_p8, %p271_p7 }
 0x354   :  { %279 = shalt.err (!%p276_p9)
}
 0x355   :  { %171 = dma.vmem_to_hbm [thread:$0]  %s169_s11, 128, %s368_s3, [#allocation6]  }
 0x356   :  { %284 = dma.done.wait [#allocation6], 128  }
 0x357   :  { %285 = vsyncadd [#allocation6], 4294967168 }
 0x358   :  { %175 = vsyncpa [#allocation5], 1 }
 0x359   :  { %176 = vsyncpa [#allocation8], 1 }
 0x35a   :  { %177 = vsyncpa [#allocation6], 1 }

</bundles_post_ra>
